<compile_context>
chip_gen: v5e
topology: v5e:2x2
jax: 0.10.0
libtpu: 0.0.40
codegen_flags: <defaults>
</compile_context>

<pallas_src>
import jax
import jax.numpy as jnp
from jax.experimental import pallas as pl
from jax.experimental.pallas import tpu as pltpu

# Logical sizes of the torch module.
D_IN = 784
D_H = 200
D_OUT = 10

# Lane-padded sizes (multiples of 128).
D_H_PAD = 256
D_OUT_PAD = 128

# Row layout of the packed weight buffer: [w1 ; w2 ; w3] stacked on axis 0.
_W1_ROWS = D_IN        # 784
_W2_ROWS = D_H_PAD     # 256
_W3_ROWS = D_H_PAD     # 256
_W_TOTAL_ROWS = _W1_ROWS + _W2_ROWS + _W3_ROWS   # 1296


def _round_up(x, m):
    return ((x + m - 1) // m) * m


def _mlp_kernel(x_ref, w_ref, b_ref, o_ref):
    """Fused 3-layer MLP on one (TM, 784) batch tile.

    x_ref: (TM, 784)    bf16   streamed batch tile
    w_ref: (1296, 256)  bf16   packed [w1(784x256); w2(256x256); w3(256x256)]
    b_ref: (8, 256)     f32    rows 0/1/2 hold b1/b2/b3 (zero padded)
    o_ref: (TM, 128)    f32    lane-dense padded output
    """
    x = x_ref[...]

    # Static, tile-aligned slices of the packed weight buffer (no repacking).
    w1 = w_ref[0:_W1_ROWS, :]                                   # (784, 256)
    w2 = w_ref[_W1_ROWS:_W1_ROWS + _W2_ROWS, :]                 # (256, 256)
    w3 = w_ref[_W1_ROWS + _W2_ROWS:_W_TOTAL_ROWS, 0:D_OUT_PAD]  # (256, 128)

    b1 = b_ref[0:1, :]
    b2 = b_ref[1:2, :]
    b3 = b_ref[2:3, 0:D_OUT_PAD]

    # bf16 operands on the MXU, f32 accumulation; bias-add + ReLU in f32.
    h1 = jnp.dot(x, w1, preferred_element_type=jnp.float32) + b1
    h1 = jnp.maximum(h1, 0.0).astype(jnp.bfloat16)
    h2 = jnp.dot(h1, w2, preferred_element_type=jnp.float32) + b2
    h2 = jnp.maximum(h2, 0.0).astype(jnp.bfloat16)
    out = jnp.dot(h2, w3, preferred_element_type=jnp.float32) + b3
    o_ref[...] = out


def pack_params(params):
    """Pack torch-layout params (w: (out, in), b: (out,)) into the two kernel
    buffers. Do this once, outside the hot path.

    Returns:
      w_packed: (1296, 256) bf16
      b_packed: (8, 256)    f32
    """
    w1, b1, w2, b2, w3, b3 = params

    def pad_to(a, shape):
        return jnp.zeros(shape, jnp.float32).at[: a.shape[0], : a.shape[1]].set(
            a.astype(jnp.float32)
        )

    w1p = pad_to(w1.T, (_W1_ROWS, D_H_PAD))   # (784, 256) cols 200..255 zero
    w2p = pad_to(w2.T, (_W2_ROWS, D_H_PAD))   # (256, 256)
    w3p = pad_to(w3.T, (_W3_ROWS, D_H_PAD))   # (256, 256) only first 10 cols nonzero
    w_packed = jnp.concatenate([w1p, w2p, w3p], axis=0).astype(jnp.bfloat16)

    b_packed = jnp.zeros((8, D_H_PAD), jnp.float32)
    b_packed = b_packed.at[0, :D_H].set(b1.astype(jnp.float32))
    b_packed = b_packed.at[1, :D_H].set(b2.astype(jnp.float32))
    b_packed = b_packed.at[2, :D_OUT].set(b3.astype(jnp.float32))
    return w_packed, b_packed


def mlp_forward(x, w_packed, b_packed, *, block_m=512):
    """x: (B, 1, 28, 28) or (B, 784). Returns (B, 10) float32."""
    B = x.shape[0]
    x2d = x.reshape(B, -1).astype(jnp.bfloat16)   # torch: x.view(B, -1)
    assert x2d.shape[1] == D_IN

    # Batch tile: multiple of 16 (bf16 min sublane tile); >=256 rows fills the
    # MXU M dim at large B, shrinks for tiny demo batches.
    tm = min(block_m, _round_up(B, 16))
    b_pad = _round_up(B, tm)
    if b_pad != B:
        x2d = jnp.pad(x2d, ((0, b_pad - B), (0, 0)))

    out = pl.pallas_call(
        _mlp_kernel,
        out_shape=jax.ShapeDtypeStruct((b_pad, D_OUT_PAD), jnp.float32),
        grid=(b_pad // tm,),
        in_specs=[
            # Streamed, double-buffered x tiles.
            pl.BlockSpec((tm, D_IN), lambda i: (i, 0)),
            # Weights / biases: same block every step -> DMA'd once, VMEM-resident.
            pl.BlockSpec((_W_TOTAL_ROWS, D_H_PAD), lambda i: (0, 0)),
            pl.BlockSpec((8, D_H_PAD), lambda i: (0, 0)),
        ],
        out_specs=pl.BlockSpec((tm, D_OUT_PAD), lambda i: (i, 0)),
        compiler_params=pltpu.CompilerParams(
            dimension_semantics=("parallel",),   # shard batch tiles across TCs (v7x)
        ),
    )(x2d, w_packed, b_packed)

    return out[:B, :D_OUT]


def init_params(key):
    """torch.nn.Linear-style init: w (out, in), b (out,), U[-1/sqrt(in), 1/sqrt(in)]."""
    def linear(key, fan_in, fan_out):
        kw, kb = jax.random.split(key)
        bound = 1.0 / float(jnp.sqrt(fan_in))
        w = jax.random.uniform(kw, (fan_out, fan_in), jnp.float32, -bound, bound)
        b = jax.random.uniform(kb, (fan_out,), jnp.float32, -bound, bound)
        return w, b

    k1, k2, k3 = jax.random.split(key, 3)
    w1, b1 = linear(k1, D_IN, D_H)
    w2, b2 = linear(k2, D_H, D_H)
    w3, b3 = linear(k3, D_H, D_OUT)
    return (w1, b1, w2, b2, w3, b3)


if __name__ == "__main__":
    key = jax.random.PRNGKey(0)
    kp, kx = jax.random.split(key)

    params = init_params(kp)
    w_packed, b_packed = pack_params(params)

    x = jax.random.normal(kx, (8, 1, 28, 28), jnp.float32)  # MNIST-like small batch

    out = mlp_forward(x, w_packed, b_packed)
    out = jax.block_until_ready(out)
    assert out.shape == (8, 10)

    # Reference in the same mixed precision (bf16 operands, f32 accumulate).
    w1, b1, w2, b2, w3, b3 = params
    xf = x.reshape(x.shape[0], -1).astype(jnp.bfloat16)
    h1 = jnp.maximum(
        jnp.dot(xf, w1.T.astype(jnp.bfloat16), preferred_element_type=jnp.float32) + b1, 0.0
    ).astype(jnp.bfloat16)
    h2 = jnp.maximum(
        jnp.dot(h1, w2.T.astype(jnp.bfloat16), preferred_element_type=jnp.float32) + b2, 0.0
    ).astype(jnp.bfloat16)
    ref_bf16 = jnp.dot(h2, w3.T.astype(jnp.bfloat16), preferred_element_type=jnp.float32) + b3
    assert jnp.allclose(out, ref_bf16, atol=2e-2, rtol=2e-2)

    # Looser sanity check vs. the full-f32 torch-equivalent math.
    f1 = jnp.maximum(x.reshape(x.shape[0], -1) @ w1.T + b1, 0.0)
    f2 = jnp.maximum(f1 @ w2.T + b2, 0.0)
    ref_f32 = f2 @ w3.T + b3
    assert jnp.allclose(out, ref_f32, atol=1e-1, rtol=1e-1)

    print("KERNEL_OK")
</pallas_src>

<mosaic_0001>
module attributes {stable_mosaic.version = 11 : i64} {
  func.func @_mlp_kernel(%arg0: i32, %arg1: memref<16x784xbf16, #tpu.memory_space<vmem>>, %arg2: memref<1296x256xbf16, #tpu.memory_space<vmem>>, %arg3: memref<8x256xf32, #tpu.memory_space<vmem>>, %arg4: memref<16x128xf32, #tpu.memory_space<vmem>>) attributes {dimension_semantics = [#tpu.dimension_semantics<parallel>], iteration_bounds = array<i64: 1>, scalar_prefetch = 0 : i64, scratch_operands = 0 : i64, tpu.core_type = #tpu.core_type<tc>, window_params = [{transform_indices = @transform_0, window_bounds = array<i64: 16, 784>}, {pipeline_mode = #tpu.pipeline_mode<synchronous>, transform_indices = @transform_1, window_bounds = array<i64: 1296, 256>}, {pipeline_mode = #tpu.pipeline_mode<synchronous>, transform_indices = @transform_2, window_bounds = array<i64: 8, 256>}, {transform_indices = @transform_3, window_bounds = array<i64: 16, 128>}]} {
    %c0 = arith.constant 0 : index
    %c0_0 = arith.constant 0 : index
    %0 = vector.load %arg1[%c0, %c0_0] : memref<16x784xbf16, #tpu.memory_space<vmem>>, vector<16x784xbf16>
    %c0_1 = arith.constant 0 : index
    %c0_2 = arith.constant 0 : index
    %1 = vector.load %arg2[%c0_1, %c0_2] : memref<1296x256xbf16, #tpu.memory_space<vmem>>, vector<784x256xbf16>
    %c784 = arith.constant 784 : index
    %c0_3 = arith.constant 0 : index
    %2 = vector.load %arg2[%c784, %c0_3] : memref<1296x256xbf16, #tpu.memory_space<vmem>>, vector<256x256xbf16>
    %c1040 = arith.constant 1040 : index
    %c0_4 = arith.constant 0 : index
    %3 = vector.load %arg2[%c1040, %c0_4] : memref<1296x256xbf16, #tpu.memory_space<vmem>>, vector<256x128xbf16>
    %c0_5 = arith.constant 0 : index
    %c0_6 = arith.constant 0 : index
    %4 = vector.load %arg3[%c0_5, %c0_6] : memref<8x256xf32, #tpu.memory_space<vmem>>, vector<1x256xf32>
    %c1 = arith.constant 1 : index
    %c0_7 = arith.constant 0 : index
    %5 = vector.load %arg3[%c1, %c0_7] : memref<8x256xf32, #tpu.memory_space<vmem>>, vector<1x256xf32>
    %c2 = arith.constant 2 : index
    %c0_8 = arith.constant 0 : index
    %6 = vector.load %arg3[%c2, %c0_8] : memref<8x256xf32, #tpu.memory_space<vmem>>, vector<1x128xf32>
    %cst = arith.constant dense<0.000000e+00> : vector<16x256xf32>
    %7 = tpu.matmul %0, %1, %cst {dimension_numbers = #tpu.dot_dimension_numbers<[1], [0], [0], [1], [0, 0, 1, 1], [], []>} : vector<16x784xbf16>, vector<784x256xbf16>, vector<16x256xf32> -> vector<16x256xf32>
    %8 = vector.broadcast %4 : vector<1x256xf32> to vector<16x256xf32>
    %9 = arith.addf %7, %8 : vector<16x256xf32>
    %cst_9 = arith.constant 0.000000e+00 : f32
    %10 = vector.broadcast %cst_9 : f32 to vector<16x256xf32>
    %11 = arith.maximumf %9, %10 : vector<16x256xf32>
    %12 = arith.truncf %11 : vector<16x256xf32> to vector<16x256xbf16>
    %cst_10 = arith.constant dense<0.000000e+00> : vector<16x256xf32>
    %13 = tpu.matmul %12, %2, %cst_10 {dimension_numbers = #tpu.dot_dimension_numbers<[1], [0], [0], [1], [0, 0, 1, 1], [], []>} : vector<16x256xbf16>, vector<256x256xbf16>, vector<16x256xf32> -> vector<16x256xf32>
    %14 = vector.broadcast %5 : vector<1x256xf32> to vector<16x256xf32>
    %15 = arith.addf %13, %14 : vector<16x256xf32>
    %cst_11 = arith.constant 0.000000e+00 : f32
    %16 = vector.broadcast %cst_11 : f32 to vector<16x256xf32>
    %17 = arith.maximumf %15, %16 : vector<16x256xf32>
    %18 = arith.truncf %17 : vector<16x256xf32> to vector<16x256xbf16>
    %cst_12 = arith.constant dense<0.000000e+00> : vector<16x128xf32>
    %19 = tpu.matmul %18, %3, %cst_12 {dimension_numbers = #tpu.dot_dimension_numbers<[1], [0], [0], [1], [0, 0, 1, 1], [], []>} : vector<16x256xbf16>, vector<256x128xbf16>, vector<16x128xf32> -> vector<16x128xf32>
    %20 = vector.broadcast %6 : vector<1x128xf32> to vector<16x128xf32>
    %21 = arith.addf %19, %20 : vector<16x128xf32>
    %c0_13 = arith.constant 0 : index
    %c0_14 = arith.constant 0 : index
    %22 = vector.load %arg4[%c0_13, %c0_14] : memref<16x128xf32, #tpu.memory_space<vmem>>, vector<16x128xf32>
    tpu.vector_store %arg4[%c0_13, %c0_14], %21 {strides = array<i32>} : memref<16x128xf32, #tpu.memory_space<vmem>>, vector<16x128xf32>,
    return
  }
  func.func @transform_0(%arg0: i32) -> (i32, i32) {
    %c0_i32 = arith.constant 0 : i32
    %c0_i32_0 = arith.constant 0 : i32
    return %arg0, %c0_i32 : i32, i32
  }
  func.func @transform_1(%arg0: i32) -> (i32, i32) {
    %c0_i32 = arith.constant 0 : i32
    %c0_i32_0 = arith.constant 0 : i32
    %c0_i32_1 = arith.constant 0 : i32
    return %c0_i32, %c0_i32_0 : i32, i32
  }
  func.func @transform_2(%arg0: i32) -> (i32, i32) {
    %c0_i32 = arith.constant 0 : i32
    %c0_i32_0 = arith.constant 0 : i32
    %c0_i32_1 = arith.constant 0 : i32
    return %c0_i32, %c0_i32_0 : i32, i32
  }
  func.func @transform_3(%arg0: i32) -> (i32, i32) {
    %c0_i32 = arith.constant 0 : i32
    %c0_i32_0 = arith.constant 0 : i32
    return %arg0, %c0_i32 : i32, i32
  }
}

</mosaic_0001>

<bundles_post_ra>
// kernel: tpu_custom_call.1
= control target key start
LH: loop header
LB: loop body
LE: loop exit
PB: predicated region body
PF: predicated region fallthrough
CT: control target
= control target key end

     0   :  { %8 = vsyncpa [#allocation3], 0  ;;  %s2301_s0 = inlined_call_operand.hbm [shape: bf16[16,784], index: 0, kind: input, shape index: {}]   ;;  %s2302_s1 = inlined_call_operand.hbm [shape: bf16[1296,256], index: 1, kind: input, shape index: {}]   ;;  %s2303_s2 = inlined_call_operand.hbm [shape: f32[8,256], index: 2, kind: input, shape index: {}]   ;;  %s2304_s3 = inlined_call_operand.hbm [shape: f32[16,128], index: 3, kind: output, shape index: {}]  }
   0x1   :  { %9 = vsyncpa [#allocation6], 0  ;;  %s28_s14 = sshll.u32 %s2302_s1, 4  ;;  %s29_s14 = int_to_ptr.hbm [resolvable:$true] %s28_s14 }
   0x2   :  { %10 = vsyncpa [#allocation4], 0  ;;  %s2221_s15 = smov [#allocation5]   ;;  %s15_s19 = sshll.u32 %s2301_s0, 4  ;;  %s16_s19 = int_to_ptr.hbm [resolvable:$true] %s15_s19 }
   0x3   :  { %s30_s16 = sshll.u32 %s2221_s15, 4  ;;  %s2222_s20 = smov 128   ;;  %s31_s16 = int_to_ptr.vmem [resolvable:$true] %s30_s16 }
   0x4   :  { %s2223_s21 = smov 8   ;;  %s2224_s22 = smov [#allocation2]  }
   0x5   :  { %36 = dma.hbm_to_vmem [thread:$0]  %s29_s14, 20736, %s31_s16, [#allocation6], %s2222_s20, %s2222_s20, %s2223_s21  }
   0x6   :  { %s17_s23 = sshll.u32 %s2224_s22, 4  ;;  %s2225_s1 = smov 448   ;;  %s18_s23 = int_to_ptr.vmem [resolvable:$true] %s17_s23 }
   0x7   :  { %s2226_s24 = smov 28   ;;  %s42_s27 = sshll.u32 %s2303_s2, 4  ;;  %s43_s27 = int_to_ptr.hbm [resolvable:$true] %s42_s27 }
   0x8   :  { %23 = dma.hbm_to_vmem [thread:$0]  %s16_s19, 896, %s18_s23, [#allocation3], %s2225_s1, %s2225_s1, %s2226_s24  }
   0x9   :  { %s2227_s28 = smov [#allocation7]  }
   0xa   :  { %s44_s0 = sshll.u32 %s2227_s28, 4  ;;  %s45_s0 = int_to_ptr.vmem [resolvable:$true] %s44_s0 }
   0xb   :  { %47 = dma.hbm_to_vmem [thread:$0]  %s43_s27, 256, %s45_s0, [#allocation6]  }
   0xc   :  { %2215 = dma.done.wait [#allocation3], 896  }
   0xd   :  { %2216 = vsyncadd [#allocation3], 4294966400 }
   0xe   :  { %2217 = dma.done.wait [#allocation6], 20992  }
   0xf   :  { %2218 = vsyncadd [#allocation6], 4294946304  ;;  %v1430_v0 = vld [vmem:[#allocation5 + $0x70] sm:$0xf]  ;;  %v1980_v1 = vld [vmem:[#allocation5 + $0x74] sm:$0xf0] }
  0x10   :  { %v1558_v2 = vld [vmem:[#allocation5 + $0x170] sm:$0xf]  ;;  %v1431_v3 = vor.u32 %v1980_v1, %v1430_v0  ;;  %v2012_v4 = vld [vmem:[#allocation5 + $0x174] sm:$0xf0]  ;;  %v1422_v11 = vld [vmem:[#allocation5 + $0x60] sm:$0xf] }
  0x11   :  { %v1622_v5 = vld [vmem:[#allocation5 + $0x1f0] sm:$0xf]  ;;  %v2028_v6 = vld [vmem:[#allocation5 + $0x1f4] sm:$0xf0]  ;;  %v1559_v7 = vor.u32 %v2012_v4, %v1558_v2  ;;  %v1978_v13 = vld [vmem:[#allocation5 + $0x64] sm:$0xf0] }
  0x12   :  { %v1623_v8 = vor.u32 %v2028_v6, %v1622_v5  ;;  %v1494_v9 = vld [vmem:[#allocation5 + $0xf0] sm:$0xf]  ;;  %v1996_v10 = vld [vmem:[#allocation5 + $0xf4] sm:$0xf0]  ;;  %769 = vmatpush.bf16.msra.mxu0 %v1431_v3  ;;  %v1550_v14 = vld [vmem:[#allocation5 + $0x160] sm:$0xf]  ;;  %v1423_v16 = vor.u32 %v1978_v13, %v1422_v11 }
  0x13   :  { %v1495_v12 = vor.u32 %v1996_v10, %v1494_v9  ;;  %v2010_v15 = vld [vmem:[#allocation5 + $0x164] sm:$0xf0]  ;;  %797 = vmatpush.bf16.msra.mxu2 %v1559_v7  ;;  %v1614_v18 = vld [vmem:[#allocation5 + $0x1e0] sm:$0xf]  ;;  %v1414_v23 = vld [vmem:[#allocation5 + $0x50] sm:$0xf] }
  0x14   :  { %811 = vmatpush.bf16.msra.mxu3 %v1623_v8  ;;  %v1551_v17 = vor.u32 %v2010_v15, %v1550_v14  ;;  %v2026_v19 = vld [vmem:[#allocation5 + $0x1e4] sm:$0xf0]  ;;  %v1486_v20 = vld [vmem:[#allocation5 + $0xe0] sm:$0xf]  ;;  %v1976_v24 = vld [vmem:[#allocation5 + $0x54] sm:$0xf0] }
  0x15   :  { %783 = vmatpush.bf16.msra.mxu1 %v1495_v12  ;;  %v1615_v21 = vor.u32 %v2026_v19, %v1614_v18  ;;  %v1994_v22 = vld [vmem:[#allocation5 + $0xe4] sm:$0xf0]  ;;  %v1542_v26 = vld [vmem:[#allocation5 + $0x150] sm:$0xf]  ;;  %v2008_v27 = vld [vmem:[#allocation5 + $0x154] sm:$0xf0]  ;;  %v1415_v29 = vor.u32 %v1976_v24, %v1414_v23 }
  0x16   :  { %v1487_v25 = vor.u32 %v1994_v22, %v1486_v20  ;;  %v1606_v28 = vld [vmem:[#allocation5 + $0x1d0] sm:$0xf]  ;;  %770 = vmatpush.bf16.msra.mxu0 %v1423_v16  ;;  %v2024_v30 = vld [vmem:[#allocation5 + $0x1d4] sm:$0xf0]  ;;  %v1543_v33 = vor.u32 %v2008_v27, %v1542_v26  ;;  %v1406_v35 = vld [vmem:[#allocation5 + $0x40] sm:$0xf] }
  0x17   :  { %v1478_v31 = vld [vmem:[#allocation5 + $0xd0] sm:$0xf]  ;;  %v1992_v32 = vld [vmem:[#allocation5 + $0xd4] sm:$0xf0]  ;;  %798 = vmatpush.bf16.msra.mxu2 %v1551_v17  ;;  %v1607_v34 = vor.u32 %v2024_v30, %v1606_v28  ;;  %v1974_v36 = vld [vmem:[#allocation5 + $0x44] sm:$0xf0] }
  0x18   :  { %812 = vmatpush.bf16.msra.mxu3 %v1615_v21  ;;  %v1534_v37 = vld [vmem:[#allocation5 + $0x140] sm:$0xf]  ;;  %v1479_v38 = vor.u32 %v1992_v32, %v1478_v31  ;;  %v2006_v39 = vld [vmem:[#allocation5 + $0x144] sm:$0xf0]  ;;  %v1407_v44 = vor.u32 %v1974_v36, %v1406_v35  ;;  %v1398_v47 = vld [vmem:[#allocation5 + $0x30] sm:$0xf] }
  0x19   :  { %784 = vmatpush.bf16.msra.mxu1 %v1487_v25  ;;  %v1598_v40 = vld [vmem:[#allocation5 + $0x1c0] sm:$0xf]  ;;  %v2022_v41 = vld [vmem:[#allocation5 + $0x1c4] sm:$0xf0]  ;;  %v1535_v45 = vor.u32 %v2006_v39, %v1534_v37  ;;  %v1972_v48 = vld [vmem:[#allocation5 + $0x34] sm:$0xf0] }
  0x1a   :  { %v1470_v42 = vld [vmem:[#allocation5 + $0xc0] sm:$0xf]  ;;  %v1990_v43 = vld [vmem:[#allocation5 + $0xc4] sm:$0xf0]  ;;  %771 = vmatpush.bf16.msra.mxu0 %v1415_v29  ;;  %v1599_v46 = vor.u32 %v2022_v41, %v1598_v40  ;;  %v1526_v49 = vld [vmem:[#allocation5 + $0x130] sm:$0xf]  ;;  %v1399_v56 = vor.u32 %v1972_v48, %v1398_v47 }
  0x1b   :  { %799 = vmatpush.bf16.msra.mxu2 %v1543_v33  ;;  %v1471_v50 = vor.u32 %v1990_v43, %v1470_v42  ;;  %v2004_v51 = vld [vmem:[#allocation5 + $0x134] sm:$0xf0]  ;;  %v1590_v52 = vld [vmem:[#allocation5 + $0x1b0] sm:$0xf]  ;;  %v1390_v59 = vld [vmem:[#allocation5 + $0x20] sm:$0xf] }
  0x1c   :  { %813 = vmatpush.bf16.msra.mxu3 %v1607_v34  ;;  %v2020_v53 = vld [vmem:[#allocation5 + $0x1b4] sm:$0xf0]  ;;  %v1462_v54 = vld [vmem:[#allocation5 + $0xb0] sm:$0xf]  ;;  %v1527_v57 = vor.u32 %v2004_v51, %v1526_v49  ;;  %v1970_v60 = vld [vmem:[#allocation5 + $0x24] sm:$0xf0] }
  0x1d   :  { %785 = vmatpush.bf16.msra.mxu1 %v1479_v38  ;;  %v1988_v55 = vld [vmem:[#allocation5 + $0xb4] sm:$0xf0]  ;;  %v1591_v58 = vor.u32 %v2020_v53, %v1590_v52  ;;  %v1518_v61 = vld [vmem:[#allocation5 + $0x120] sm:$0xf]  ;;  %v2002_v63 = vld [vmem:[#allocation5 + $0x124] sm:$0xf0]  ;;  %v1391_v4 = vor.u32 %v1970_v60, %v1390_v59 }
  0x1e   :  { %772 = vmatpush.bf16.msra.mxu0 %v1407_v44  ;;  %v1463_v62 = vor.u32 %v1988_v55, %v1462_v54  ;;  %v1582_v0 = vld [vmem:[#allocation5 + $0x1a0] sm:$0xf]  ;;  %v2018_v1 = vld [vmem:[#allocation5 + $0x1a4] sm:$0xf0]  ;;  %v1382_v5 = vld [vmem:[#allocation5 + $0x10] sm:$0xf]  ;;  %v1519_v6 = vor.u32 %v2002_v63, %v1518_v61 }
  0x1f   :  { %800 = vmatpush.bf16.msra.mxu2 %v1535_v45  ;;  %v1454_v2 = vld [vmem:[#allocation5 + $0xa0] sm:$0xf]  ;;  %v1986_v3 = vld [vmem:[#allocation5 + $0xa4] sm:$0xf0]  ;;  %v1583_v7 = vor.u32 %v2018_v1, %v1582_v0  ;;  %v1968_v8 = vld [vmem:[#allocation5 + $0x14] sm:$0xf0] }
  0x20   :  { %814 = vmatpush.bf16.msra.mxu3 %v1599_v46  ;;  %v1510_v9 = vld [vmem:[#allocation5 + $0x110] sm:$0xf]  ;;  %v2000_v10 = vld [vmem:[#allocation5 + $0x114] sm:$0xf0]  ;;  %v1455_v11 = vor.u32 %v1986_v3, %v1454_v2  ;;  %v1374_v16 = vld [vmem:[#allocation5] sm:$0xf]  ;;  %v1383_v18 = vor.u32 %v1968_v8, %v1382_v5 }
  0x21   :  { %786 = vmatpush.bf16.msra.mxu1 %v1471_v50  ;;  %v1574_v12 = vld [vmem:[#allocation5 + $0x190] sm:$0xf]  ;;  %v2016_v13 = vld [vmem:[#allocation5 + $0x194] sm:$0xf0]  ;;  %v1966_v17 = vld [vmem:[#allocation5 + $0x4] sm:$0xf0]  ;;  %v1511_v23 = vor.u32 %v2000_v10, %v1510_v9 }
  0x22   :  { %773 = vmatpush.bf16.msra.mxu0 %v1399_v56  ;;  %v1446_v14 = vld [vmem:[#allocation5 + $0x90] sm:$0xf]  ;;  %v1984_v15 = vld [vmem:[#allocation5 + $0x94] sm:$0xf0]  ;;  %v1502_v19 = vld [vmem:[#allocation5 + $0x100] sm:$0xf]  ;;  %v1575_v24 = vor.u32 %v2016_v13, %v1574_v12  ;;  %v1375_v35 = vor.u32 %v1966_v17, %v1374_v16 }
  0x23   :  { %801 = vmatpush.bf16.msra.mxu2 %v1527_v57  ;;  %v1998_v20 = vld [vmem:[#allocation5 + $0x104] sm:$0xf0]  ;;  %v1566_v21 = vld [vmem:[#allocation5 + $0x180] sm:$0xf]  ;;  %v1686_v25 = vld [vmem:[#allocation5 + $0x270] sm:$0xf]  ;;  %v1447_v28 = vor.u32 %v1984_v15, %v1446_v14 }
  0x24   :  { %815 = vmatpush.bf16.msra.mxu3 %v1591_v58  ;;  %v2014_v22 = vld [vmem:[#allocation5 + $0x184] sm:$0xf0]  ;;  %v2044_v26 = vld [vmem:[#allocation5 + $0x274] sm:$0xf0]  ;;  %v1979_v27 = vld [vmem:[#allocation5 + $0x74] sm:$0xf]  ;;  %v1503_v39 = vor.u32 %v1998_v20, %v1502_v19 }
  0x25   :  { %787 = vmatpush.bf16.msra.mxu1 %v1463_v62  ;;  %v1432_v29 = vld [vmem:[#allocation5 + $0x78] sm:$0xf0]  ;;  %v1438_v30 = vld [vmem:[#allocation5 + $0x80] sm:$0xf]  ;;  %v1982_v31 = vld [vmem:[#allocation5 + $0x84] sm:$0xf0]  ;;  %v1567_v40 = vor.u32 %v2014_v22, %v1566_v21  ;;  %v1687_v44 = vor.u32 %v2044_v26, %v1686_v25 }
  0x26   :  { %774 = vmatpush.bf16.msra.mxu0 %v1391_v4  ;;  %v1354_v32 = vld [vmem:[#allocation2 + $0x8] sm:$0xf]  ;;  %v1962_v33 = vld [vmem:[#allocation2 + $0x20] sm:$0xf0]  ;;  %v2060_v36 = vld [vmem:[#allocation5 + $0x2f4] sm:$0xf0]  ;;  %v1435_v45 = vor.u32 %v1979_v27, %v1432_v29  ;;  %v1439_v49 = vor.u32 %v1982_v31, %v1438_v30 }
  0x27   :  { %802 = vmatpush.bf16.msra.mxu2 %v1519_v6  ;;  %v1750_v34 = vld [vmem:[#allocation5 + $0x2f0] sm:$0xf]  ;;  %v1758_v37 = vld [vmem:[#allocation5 + $0x300] sm:$0xf]  ;;  %v2062_v38 = vld [vmem:[#allocation5 + $0x304] sm:$0xf0]  ;;  %v2261_v54 = vor.u32 %v1962_v33, %v1354_v32 }
  0x28   :  { %816 = vmatpush.bf16.msra.mxu3 %v1583_v7  ;;  %v1995_v41 = vld [vmem:[#allocation5 + $0xf4] sm:$0xf]  ;;  %v1496_v42 = vld [vmem:[#allocation5 + $0xf8] sm:$0xf0]  ;;  %v1346_v43 = vld [vmem:[#allocation2] sm:$0xf]  ;;  %v1759_v50 = vor.u32 %v2062_v38, %v1758_v37  ;;  %v1751_v55 = vor.u32 %v2060_v36, %v1750_v34 }
  0x29   :  { %788 = vmatpush.bf16.msra.mxu1 %v1455_v11  ;;  %v1961_v46 = vld [vmem:[#allocation2 + $0x18] sm:$0xf0]  ;;  %v1959_v47 = vld [vmem:[#allocation2 + $0xc] sm:$0xf]  ;;  %v1356_v48 = vld [vmem:[#allocation2 + $0x24] sm:$0xf0]  ;;  %v1499_v59 = vor.u32 %v1995_v41, %v1496_v42 }
  0x2a   :  { %775 = vmatpush.bf16.msra.mxu0 %v1383_v18  ;;  %v1678_v51 = vld [vmem:[#allocation5 + $0x260] sm:$0xf]  ;;  %v2042_v52 = vld [vmem:[#allocation5 + $0x264] sm:$0xf0]  ;;  %v1977_v53 = vld [vmem:[#allocation5 + $0x64] sm:$0xf]  ;;  %v2263_v60 = vor.u32 %v1961_v46, %v1346_v43  ;;  %v2265_v63 = vor.u32 %v1959_v47, %v1356_v48 }
  0x2b   :  { %803 = vmatpush.bf16.msra.mxu2 %v1511_v23  ;;  %v1424_v56 = vld [vmem:[#allocation5 + $0x68] sm:$0xf0]  ;;  %v1348_v58 = vld [vmem:[#allocation2 + $0x1c] sm:$0xf0]  ;;  %v1742_v61 = vld [vmem:[#allocation5 + $0x2e0] sm:$0xf]  ;;  %v1679_v0 = vor.u32 %v2042_v52, %v1678_v51 }
  0x2c   :  { %817 = vmatpush.bf16.msra.mxu3 %v1575_v24  ;;  %v1958_v57 = vld [vmem:[#allocation2 + $0x4] sm:$0xf]  ;;  %v2058_v62 = vld [vmem:[#allocation5 + $0x2e4] sm:$0xf0]  ;;  %v1993_v1 = vld [vmem:[#allocation5 + $0xe4] sm:$0xf]  ;;  %v1427_v3 = vor.u32 %v1977_v53, %v1424_v56 }
  0x2d   :  { %789 = vmatpush.bf16.msra.mxu1 %v1447_v28  ;;  %v1488_v2 = vld [vmem:[#allocation5 + $0xe8] sm:$0xf0]  ;;  %v2267_v4 = vor.u32 %v1958_v57, %v1348_v58  ;;  %v1670_v5 = vld [vmem:[#allocation5 + $0x250] sm:$0xf]  ;;  %v2040_v6 = vld [vmem:[#allocation5 + $0x254] sm:$0xf0]  ;;  %v1743_v7 = vor.u32 %v2058_v62, %v1742_v61 }
  0x2e   :  { %776 = vmatpush.bf16.msra.mxu0 %v1375_v35  ;;  %v1975_v8 = vld [vmem:[#allocation5 + $0x54] sm:$0xf]  ;;  %v1416_v9 = vld [vmem:[#allocation5 + $0x58] sm:$0xf0]  ;;  %v1491_v10 = vor.u32 %v1993_v1, %v1488_v2  ;;  %v1734_v11 = vld [vmem:[#allocation5 + $0x2d0] sm:$0xf]  ;;  %v1671_v13 = vor.u32 %v2040_v6, %v1670_v5 }
  0x2f   :  { %804 = vmatpush.bf16.msra.mxu2 %v1503_v39  ;;  %v2056_v12 = vld [vmem:[#allocation5 + $0x2d4] sm:$0xf0]  ;;  %v1991_v14 = vld [vmem:[#allocation5 + $0xd4] sm:$0xf]  ;;  %v1480_v15 = vld [vmem:[#allocation5 + $0xd8] sm:$0xf0]  ;;  %v1419_v16 = vor.u32 %v1975_v8, %v1416_v9 }
  0x30   :  { %818 = vmatpush.bf16.msra.mxu3 %v1567_v40  ;;  %v1662_v17 = vld [vmem:[#allocation5 + $0x240] sm:$0xf]  ;;  %v2038_v18 = vld [vmem:[#allocation5 + $0x244] sm:$0xf0]  ;;  %v1735_v19 = vor.u32 %v2056_v12, %v1734_v11  ;;  %v1973_v20 = vld [vmem:[#allocation5 + $0x44] sm:$0xf]  ;;  %v1483_v22 = vor.u32 %v1991_v14, %v1480_v15 }
  0x31   :  { %790 = vmatpush.bf16.msra.mxu1 %v1439_v49  ;;  %777 = vmatmul.bf16.vlgmr.msra.gmra.mxu0 %v2263_v60  ;;  %v1408_v21 = vld [vmem:[#allocation5 + $0x48] sm:$0xf0]  ;;  %v1726_v23 = vld [vmem:[#allocation5 + $0x2c0] sm:$0xf]  ;;  %v2054_v24 = vld [vmem:[#allocation5 + $0x2c4] sm:$0xf0]  ;;  %v1663_v25 = vor.u32 %v2038_v18, %v1662_v17 }
  0x32   :  { %825 = vmatpush.bf16.msrb.mxu0 %v1687_v44  ;;  %805 = vmatmul.bf16.vlgmr.msra.gmra.mxu2 %v2261_v54  ;;  %v1989_v26 = vld [vmem:[#allocation5 + $0xc4] sm:$0xf]  ;;  %v1472_v27 = vld [vmem:[#allocation5 + $0xc8] sm:$0xf0]  ;;  %v1411_v28 = vor.u32 %v1973_v20, %v1408_v21  ;;  %v1654_v29 = vld [vmem:[#allocation5 + $0x230] sm:$0xf]  ;;  %v1727_v31 = vor.u32 %v2054_v24, %v1726_v23 }
  0x33   :  { %860 = vmatpush.bf16.msrb.mxu2 %v1759_v50  ;;  %819 = vmatmul.bf16.vlgmr.msra.gmra.mxu3 %v2265_v63  ;;  %v2036_v30 = vld [vmem:[#allocation5 + $0x234] sm:$0xf0]  ;;  %v1971_v32 = vld [vmem:[#allocation5 + $0x34] sm:$0xf]  ;;  %v1400_v33 = vld [vmem:[#allocation5 + $0x38] sm:$0xf0]  ;;  %v1475_v35 = vor.u32 %v1989_v26, %v1472_v27 }
  0x34   :  { %867 = vmatpush.bf16.msrb.mxu3 %v1435_v45  ;;  %791 = vmatmul.bf16.vlgmr.msra.gmra.mxu1 %v2267_v4  ;;  %v1718_v34 = vld [vmem:[#allocation5 + $0x2b0] sm:$0xf]  ;;  %v2052_v36 = vld [vmem:[#allocation5 + $0x2b4] sm:$0xf0]  ;;  %v1370_v37 = vld [vmem:[#allocation2 + $0x18] sm:$0xf]  ;;  %v1655_v39 = vor.u32 %v2036_v30, %v1654_v29  ;;  %v1403_v42 = vor.u32 %v1971_v32, %v1400_v33 }
  0x35   :  { %839 = vmatpush.bf16.msrb.mxu1 %v1751_v55  ;;  %v1964_v38 = vld [vmem:[#allocation2 + $0x30] sm:$0xf0]  ;;  %v1987_v40 = vld [vmem:[#allocation5 + $0xb4] sm:$0xf]  ;;  %v1646_v43 = vld [vmem:[#allocation5 + $0x220] sm:$0xf]  ;;  %v1719_v45 = vor.u32 %v2052_v36, %v1718_v34 }
  0x36   :  { %826 = vmatpush.bf16.msrb.mxu0 %v1679_v0  ;;  %v1464_v41 = vld [vmem:[#allocation5 + $0xb8] sm:$0xf0]  ;;  %v2034_v44 = vld [vmem:[#allocation5 + $0x224] sm:$0xf0]  ;;  %v1969_v46 = vld [vmem:[#allocation5 + $0x24] sm:$0xf]  ;;  %v2273_v48 = vor.u32 %v1964_v38, %v1370_v37 }
  0x37   :  { %881 = vmatpush.bf16.msra.mxu2 %v1499_v59  ;;  %v1392_v47 = vld [vmem:[#allocation5 + $0x28] sm:$0xf0]  ;;  %v1467_v49 = vor.u32 %v1987_v40, %v1464_v41  ;;  %v1710_v50 = vld [vmem:[#allocation5 + $0x2a0] sm:$0xf]  ;;  %v2050_v51 = vld [vmem:[#allocation5 + $0x2a4] sm:$0xf0]  ;;  %v1647_v52 = vor.u32 %v2034_v44, %v1646_v43 }
  0x38   :  { %868 = vmatpush.bf16.msrb.mxu3 %v1427_v3  ;;  %vm765_vm0 = vcmask 130048   ;;  %v1985_v53 = vld [vmem:[#allocation5 + $0xa4] sm:$0xf]  ;;  %v1456_v55 = vld [vmem:[#allocation5 + $0xa8] sm:$0xf0]  ;;  %v1395_v56 = vor.u32 %v1969_v46, %v1392_v47  ;;  %v1711_v61 = vor.u32 %v2050_v51, %v1710_v50  ;;  %s2228_s2 = smov [#allocation8]  }
  0x39   :  { %840 = vmatpush.bf16.msrb.mxu1 %v1743_v7  ;;  %v1638_v57 = vld [vmem:[#allocation5 + $0x210] sm:$0xf]  ;;  %v2032_v58 = vld [vmem:[#allocation5 + $0x214] sm:$0xf0]  ;;  %v1967_v59 = vld [vmem:[#allocation5 + $0x14] sm:$0xf]  ;;  %v1459_v2 = vor.u32 %v1985_v53, %v1456_v55 }
  0x3a   :  { %827 = vmatpush.bf16.msrb.mxu0 %v1671_v13  ;;  %v1384_v62 = vld [vmem:[#allocation5 + $0x18] sm:$0xf0]  ;;  %v1702_v0 = vld [vmem:[#allocation5 + $0x290] sm:$0xf]  ;;  %v2048_v1 = vld [vmem:[#allocation5 + $0x294] sm:$0xf0]  ;;  %v1639_v7 = vor.u32 %v2032_v58, %v1638_v57 }
  0x3b   :  { %882 = vmatpush.bf16.msra.mxu2 %v1491_v10  ;;  %v1983_v3 = vld [vmem:[#allocation5 + $0x94] sm:$0xf]  ;;  %v1448_v5 = vld [vmem:[#allocation5 + $0x98] sm:$0xf0]  ;;  %v1630_v6 = vld [vmem:[#allocation5 + $0x200] sm:$0xf]  ;;  %v1387_v11 = vor.u32 %v1967_v59, %v1384_v62  ;;  %v1703_v15 = vor.u32 %v2048_v1, %v1702_v0 }
  0x3c   :  { %869 = vmatpush.bf16.msrb.mxu3 %v1419_v16  ;;  %v2030_v8 = vld [vmem:[#allocation5 + $0x204] sm:$0xf0]  ;;  %v1965_v9 = vld [vmem:[#allocation5 + $0x4] sm:$0xf]  ;;  %v1376_v10 = vld [vmem:[#allocation5 + $0x8] sm:$0xf0] }
  0x3d   :  { %841 = vmatpush.bf16.msrb.mxu1 %v1735_v19  ;;  %v2011_v12 = vld [vmem:[#allocation5 + $0x174] sm:$0xf]  ;;  %v1560_v13 = vld [vmem:[#allocation5 + $0x178] sm:$0xf0]  ;;  %v1694_v17 = vld [vmem:[#allocation5 + $0x280] sm:$0xf]  ;;  %v1451_v19 = vor.u32 %v1983_v3, %v1448_v5  ;;  %v1631_v23 = vor.u32 %v2030_v8, %v1630_v6  ;;  %v1379_v27 = vor.u32 %v1965_v9, %v1376_v10 }
  0x3e   :  { %828 = vmatpush.bf16.msrb.mxu0 %v1663_v25  ;;  %v2043_v14 = vld [vmem:[#allocation5 + $0x274] sm:$0xf]  ;;  %v1688_v16 = vld [vmem:[#allocation5 + $0x278] sm:$0xf0]  ;;  %v2046_v18 = vld [vmem:[#allocation5 + $0x284] sm:$0xf0] }
  0x3f   :  { %883 = vmatpush.bf16.msra.mxu2 %v1483_v22  ;;  %v1362_v20 = vld [vmem:[#allocation2 + $0x10] sm:$0xf]  ;;  %v1963_v21 = vld [vmem:[#allocation2 + $0x28] sm:$0xf0]  ;;  %v1981_v22 = vld [vmem:[#allocation5 + $0x84] sm:$0xf]  ;;  %v1691_v32 = vor.u32 %v2043_v14, %v1688_v16  ;;  %v1695_v33 = vor.u32 %v2046_v18, %v1694_v17 }
  0x40   :  { %870 = vmatpush.bf16.msrb.mxu3 %v1411_v28  ;;  %v1440_v24 = vld [vmem:[#allocation5 + $0x88] sm:$0xf0]  ;;  %v2027_v25 = vld [vmem:[#allocation5 + $0x1f4] sm:$0xf]  ;;  %v1624_v26 = vld [vmem:[#allocation5 + $0x1f8] sm:$0xf0]  ;;  %v1563_v28 = vor.u32 %v2011_v12, %v1560_v13  ;;  %v2277_v37 = vor.u32 %v1963_v21, %v1362_v20 }
  0x41   :  { %842 = vmatpush.bf16.msrb.mxu1 %v1727_v31  ;;  %v2059_v29 = vld [vmem:[#allocation5 + $0x2f4] sm:$0xf]  ;;  %v1752_v30 = vld [vmem:[#allocation5 + $0x2f8] sm:$0xf0]  ;;  %v1364_v34 = vld [vmem:[#allocation2 + $0x2c] sm:$0xf0]  ;;  %v1443_v38 = vor.u32 %v1981_v22, %v1440_v24  ;;  %v1627_v41 = vor.u32 %v2027_v25, %v1624_v26 }
  0x42   :  { %829 = vmatpush.bf16.msrb.mxu0 %v1655_v39  ;;  %1764 = vmatmul.msk.bf16.vlgmr.msrb.gmra.mxu2 %vm765_vm0, %v2273_v48  ;;  %v1960_v31 = vld [vmem:[#allocation2 + $0x14] sm:$0xf]  ;;  %v1552_v36 = vld [vmem:[#allocation5 + $0x168] sm:$0xf0]  ;;  %v2041_v39 = vld [vmem:[#allocation5 + $0x264] sm:$0xf] }
  0x43   :  { %884 = vmatpush.bf16.msra.mxu2 %v1475_v35  ;;  %v2009_v35 = vld [vmem:[#allocation5 + $0x164] sm:$0xf]  ;;  %v1680_v40 = vld [vmem:[#allocation5 + $0x268] sm:$0xf0]  ;;  %v2279_v44 = vor.u32 %v1960_v31, %v1364_v34  ;;  %v2007_v51 = vld [vmem:[#allocation5 + $0x154] sm:$0xf] }
  0x44   :  { %871 = vmatpush.bf16.msrb.mxu3 %v1403_v42  ;;  %v1755_v42 = vor.u32 %v2059_v29, %v1752_v30  ;;  %v2025_v43 = vld [vmem:[#allocation5 + $0x1e4] sm:$0xf]  ;;  %v1616_v46 = vld [vmem:[#allocation5 + $0x1e8] sm:$0xf0]  ;;  %v1683_v50 = vor.u32 %v2041_v39, %v1680_v40  ;;  %v2039_v53 = vld [vmem:[#allocation5 + $0x254] sm:$0xf] }
  0x45   :  { %843 = vmatpush.bf16.msrb.mxu1 %v1719_v45  ;;  %v1555_v45 = vor.u32 %v2009_v35, %v1552_v36  ;;  %v2057_v47 = vld [vmem:[#allocation5 + $0x2e4] sm:$0xf]  ;;  %v1672_v55 = vld [vmem:[#allocation5 + $0x258] sm:$0xf0]  ;;  %v2023_v58 = vld [vmem:[#allocation5 + $0x1d4] sm:$0xf] }
  0x46   :  { %830 = vmatpush.bf16.msrb.mxu0 %v1647_v52  ;;  %v1544_v52 = vld [vmem:[#allocation5 + $0x158] sm:$0xf0]  ;;  %v2055_v62 = vld [vmem:[#allocation5 + $0x2d4] sm:$0xf]  ;;  %v1675_v1 = vor.u32 %v2039_v53, %v1672_v55  ;;  %v1536_v3 = vld [vmem:[#allocation5 + $0x148] sm:$0xf0] }
  0x47   :  { %885 = vmatpush.bf16.msra.mxu2 %v1467_v49  ;;  %v1744_v49 = vld [vmem:[#allocation5 + $0x2e8] sm:$0xf0]  ;;  %v1547_v59 = vor.u32 %v2007_v51, %v1544_v52  ;;  %v1736_v0 = vld [vmem:[#allocation5 + $0x2d8] sm:$0xf0]  ;;  %v2037_v5 = vld [vmem:[#allocation5 + $0x244] sm:$0xf] }
  0x48   :  { %872 = vmatpush.bf16.msrb.mxu3 %v1395_v56  ;;  %v1619_v56 = vor.u32 %v2025_v43, %v1616_v46  ;;  %v1747_v57 = vor.u32 %v2057_v47, %v1744_v49  ;;  %v1664_v6 = vld [vmem:[#allocation5 + $0x248] sm:$0xf0]  ;;  %v1739_v8 = vor.u32 %v2055_v62, %v1736_v0  ;;  %v2021_v9 = vld [vmem:[#allocation5 + $0x1c4] sm:$0xf]  ;;  %v1528_v16 = vld [vmem:[#allocation5 + $0x138] sm:$0xf0] }
  0x49   :  { %844 = vmatpush.bf16.msrb.mxu1 %v1711_v61  ;;  %v1608_v61 = vld [vmem:[#allocation5 + $0x1d8] sm:$0xf0]  ;;  %v2053_v12 = vld [vmem:[#allocation5 + $0x2c4] sm:$0xf]  ;;  %v1728_v13 = vld [vmem:[#allocation5 + $0x2c8] sm:$0xf0]  ;;  %v1667_v14 = vor.u32 %v2037_v5, %v1664_v6 }
  0x4a   :  { %831 = vmatpush.bf16.msrb.mxu0 %v1639_v7  ;;  %v1611_v7 = vor.u32 %v2023_v58, %v1608_v61  ;;  %v2035_v17 = vld [vmem:[#allocation5 + $0x234] sm:$0xf]  ;;  %v1592_v21 = vld [vmem:[#allocation5 + $0x1b8] sm:$0xf0]  ;;  %v2001_v25 = vld [vmem:[#allocation5 + $0x124] sm:$0xf] }
  0x4b   :  { %886 = vmatpush.bf16.msra.mxu2 %v1459_v2  ;;  %v2005_v2 = vld [vmem:[#allocation5 + $0x144] sm:$0xf]  ;;  %v2051_v22 = vld [vmem:[#allocation5 + $0x2b4] sm:$0xf]  ;;  %v1520_v26 = vld [vmem:[#allocation5 + $0x128] sm:$0xf0] }
  0x4c   :  { %873 = vmatpush.bf16.msrb.mxu3 %v1387_v11  ;;  %v1539_v10 = vor.u32 %v2005_v2, %v1536_v3  ;;  %v1600_v11 = vld [vmem:[#allocation5 + $0x1c8] sm:$0xf0]  ;;  %v2017_v31 = vld [vmem:[#allocation5 + $0x1a4] sm:$0xf]  ;;  %v1512_v39 = vld [vmem:[#allocation5 + $0x118] sm:$0xf0] }
  0x4d   :  { %845 = vmatpush.bf16.msrb.mxu1 %v1703_v15  ;;  %v2003_v15 = vld [vmem:[#allocation5 + $0x134] sm:$0xf]  ;;  %v1603_v18 = vor.u32 %v2021_v9, %v1600_v11  ;;  %v2049_v34 = vld [vmem:[#allocation5 + $0x2a4] sm:$0xf]  ;;  %v1712_v35 = vld [vmem:[#allocation5 + $0x2a8] sm:$0xf0] }
  0x4e   :  { %832 = vmatpush.bf16.msrb.mxu0 %v1631_v23  ;;  %v1531_v20 = vor.u32 %v2003_v15, %v1528_v16  ;;  %v1720_v23 = vld [vmem:[#allocation5 + $0x2b8] sm:$0xf0]  ;;  %v2031_v40 = vld [vmem:[#allocation5 + $0x214] sm:$0xf]  ;;  %v1715_v43 = vor.u32 %v2049_v34, %v1712_v35  ;;  %v1997_v52 = vld [vmem:[#allocation5 + $0x104] sm:$0xf] }
  0x4f   :  { %887 = vmatpush.bf16.msra.mxu2 %v1451_v19  ;;  %v2019_v19 = vld [vmem:[#allocation5 + $0x1b4] sm:$0xf]  ;;  %v1723_v30 = vor.u32 %v2051_v22, %v1720_v23  ;;  %v1576_v47 = vld [vmem:[#allocation5 + $0x198] sm:$0xf0]  ;;  %v1504_v53 = vld [vmem:[#allocation5 + $0x108] sm:$0xf0] }
  0x50   :  { %874 = vmatpush.bf16.msrb.mxu3 %v1379_v27  ;;  %v2033_v27 = vld [vmem:[#allocation5 + $0x224] sm:$0xf]  ;;  %v1595_v29 = vor.u32 %v2019_v19, %v1592_v21  ;;  %v2047_v49 = vld [vmem:[#allocation5 + $0x294] sm:$0xf]  ;;  %v1760_v58 = vld [vmem:[#allocation5 + $0x308] sm:$0xf0]  ;;  %v1507_v62 = vor.u32 %v1997_v52, %v1504_v53 }
  0x51   :  { %846 = vmatpush.bf16.msrb.mxu1 %v1695_v33  ;;  %833 = vmatmul.bf16.vlgmr.msrb.gmra.mxu0 %v2277_v37  ;;  %v1584_v33 = vld [vmem:[#allocation5 + $0x1a8] sm:$0xf0]  ;;  %v2029_v55 = vld [vmem:[#allocation5 + $0x204] sm:$0xf]  ;;  %v1824_v9 = vld [vmem:[#allocation5 + $0x380] sm:$0xf] }
  0x52   :  { %895 = vmatpush.bf16.msra.mxu0 %v1563_v28  ;;  %v1648_v28 = vld [vmem:[#allocation5 + $0x228] sm:$0xf0]  ;;  %v2013_v0 = vld [vmem:[#allocation5 + $0x184] sm:$0xf]  ;;  %v1816_v15 = vld [vmem:[#allocation5 + $0x370] sm:$0xf] }
  0x53   :  { %888 = vmatpush.bf16.msra.mxu2 %v1443_v38  ;;  %875 = vmatmul.bf16.vlgmr.msrb.gmra.mxu3 %v2263_v60  ;;  %v1731_v60 = vor.u32 %v2053_v12, %v1728_v13  ;;  %v1651_v36 = vor.u32 %v2033_v27, %v1648_v28  ;;  %v1999_v38 = vld [vmem:[#allocation5 + $0x114] sm:$0xf]  ;;  %v2045_v3 = vld [vmem:[#allocation5 + $0x284] sm:$0xf]  ;;  %v1696_v5 = vld [vmem:[#allocation5 + $0x288] sm:$0xf0] }
  0x54   :  { %923 = vmatpush.bf16.msra.mxu3 %v1691_v32  ;;  %847 = vmatmul.bf16.vlgmr.msrb.gmra.mxu1 %v2279_v44  ;;  %v1523_v32 = vor.u32 %v2001_v25, %v1520_v26  ;;  %v1515_v46 = vor.u32 %v1999_v38, %v1512_v39  ;;  %v2077_v11 = vld [vmem:[#allocation5 + $0x384] sm:$0xf]  ;;  %v1826_v13 = vld [vmem:[#allocation5 + $0x388] sm:$0xf0]  ;;  %v2076_v16 = vld [vmem:[#allocation5 + $0x374] sm:$0xf0] }
  0x55   :  { %909 = vmatpush.bf16.msra.mxu1 %v1627_v41  ;;  %v1640_v41 = vld [vmem:[#allocation5 + $0x218] sm:$0xf0]  ;;  %v2072_v21 = vld [vmem:[#allocation5 + $0x354] sm:$0xf0]  ;;  %v2071_v22 = vld [vmem:[#allocation5 + $0x354] sm:$0xf] }
  0x56   :  { %896 = vmatpush.bf16.msra.mxu0 %v1555_v45  ;;  %889 = vmatmul.bf16.vlgmr.msra.gmra.mxu2 %v2267_v4  ;;  %v1656_v4 = vld [vmem:[#allocation5 + $0x238] sm:$0xf0]  ;;  %v2015_v45 = vld [vmem:[#allocation5 + $0x194] sm:$0xf]  ;;  %v1643_v51 = vor.u32 %v2031_v40, %v1640_v41  ;;  %v1792_v26 = vld [vmem:[#allocation5 + $0x340] sm:$0xf] }
  0x57   :  { %937 = vmatpush.bf16.msrb.mxu2 %v1755_v42  ;;  %v1659_v24 = vor.u32 %v2035_v17, %v1656_v4  ;;  %v1587_v42 = vor.u32 %v2017_v31, %v1584_v33  ;;  %v2075_v17 = vld [vmem:[#allocation5 + $0x374] sm:$0xf]  ;;  %v2070_v27 = vld [vmem:[#allocation5 + $0x344] sm:$0xf0]  ;;  %v2069_v28 = vld [vmem:[#allocation5 + $0x344] sm:$0xf] }
  0x58   :  { %924 = vmatpush.bf16.msra.mxu3 %v1683_v50  ;;  %v1704_v50 = vld [vmem:[#allocation5 + $0x298] sm:$0xf0]  ;;  %v2068_v33 = vld [vmem:[#allocation5 + $0x334] sm:$0xf0]  ;;  %v2067_v34 = vld [vmem:[#allocation5 + $0x334] sm:$0xf] }
  0x59   :  { %910 = vmatpush.bf16.msra.mxu1 %v1619_v56  ;;  %v1632_v56 = vld [vmem:[#allocation5 + $0x208] sm:$0xf0]  ;;  %v1707_v61 = vor.u32 %v2047_v49, %v1704_v50  ;;  %v1776_v39 = vld [vmem:[#allocation5 + $0x320] sm:$0xf]  ;;  %v2066_v40 = vld [vmem:[#allocation5 + $0x324] sm:$0xf0] }
  0x5a   :  { %897 = vmatpush.bf16.msra.mxu0 %v1547_v59  ;;  %v1579_v59 = vor.u32 %v2015_v45, %v1576_v47  ;;  %v1635_v2 = vor.u32 %v2029_v55, %v1632_v56  ;;  %v2065_v41 = vld [vmem:[#allocation5 + $0x324] sm:$0xf]  ;;  %v1768_v50 = vld [vmem:[#allocation5 + $0x310] sm:$0xf]  ;;  %v2063_v52 = vld [vmem:[#allocation5 + $0x314] sm:$0xf] }
  0x5b   :  { %938 = vmatpush.bf16.msrb.mxu2 %v1747_v57  ;;  %v2061_v57 = vld [vmem:[#allocation5 + $0x304] sm:$0xf]  ;;  %v1770_v55 = vld [vmem:[#allocation5 + $0x318] sm:$0xf0]  ;;  %s1328_s29 = sshll.u32 %s2228_s2, 4  ;;  %s1330_s5 = sshll.u32 %s2304_s3, 4  ;;  %s1329_s29 = int_to_ptr.vmem [resolvable:$true] %s1328_s29  ;;  %s1331_s5 = int_to_ptr.hbm [resolvable:$true] %s1330_s5 }
  0x5c   :  { %925 = vmatpush.bf16.msra.mxu3 %v1675_v1  ;;  %v1568_v1 = vld [vmem:[#allocation5 + $0x188] sm:$0xf0]  ;;  %v1763_v6 = vor.u32 %v2061_v57, %v1760_v58  ;;  %v1773_v57 = vor.u32 %v2063_v52, %v1770_v55  ;;  %v1848_v52 = vld [vmem:[#allocation5 + $0x3b0] sm:$0xf] }
  0x5d   :  { %911 = vmatpush.bf16.msra.mxu1 %v1611_v7  ;;  %v1571_v7 = vor.u32 %v2013_v0, %v1568_v1 }
  0x5e   :  { %898 = vmatpush.bf16.msra.mxu0 %v1539_v10  ;;  %v2078_v10 = vld [vmem:[#allocation5 + $0x384] sm:$0xf0] }
  0x5f   :  { %939 = vmatpush.bf16.msrb.mxu2 %v1739_v8  ;;  %v1699_v8 = vor.u32 %v2045_v3, %v1696_v5  ;;  %v1825_v12 = vor.u32 %v2078_v10, %v1824_v9  ;;  %v1888_v5 = vld [vmem:[#allocation5 + $0x400] sm:$0xf]  ;;  %v1890_v9 = vld [vmem:[#allocation5 + $0x408] sm:$0xf0] }
  0x60   :  { %926 = vmatpush.bf16.msra.mxu3 %v1667_v14  ;;  %v1829_v14 = vor.u32 %v2077_v11, %v1826_v13  ;;  %v1880_v13 = vld [vmem:[#allocation5 + $0x3f0] sm:$0xf] }
  0x61   :  { %912 = vmatpush.bf16.msra.mxu1 %v1603_v18  ;;  %v2074_v18 = vld [vmem:[#allocation5 + $0x364] sm:$0xf0] }
  0x62   :  { %899 = vmatpush.bf16.msra.mxu0 %v1531_v20  ;;  %v1800_v20 = vld [vmem:[#allocation5 + $0x350] sm:$0xf] }
  0x63   :  { %940 = vmatpush.bf16.msrb.mxu2 %v1731_v60  ;;  %v1810_v60 = vld [vmem:[#allocation5 + $0x368] sm:$0xf0]  ;;  %v1801_v23 = vor.u32 %v2072_v21, %v1800_v20  ;;  %v2089_v20 = vld [vmem:[#allocation5 + $0x3e4] sm:$0xf] }
  0x64   :  { %927 = vmatpush.bf16.msra.mxu3 %v1659_v24  ;;  %v1802_v24 = vld [vmem:[#allocation5 + $0x358] sm:$0xf0] }
  0x65   :  { %913 = vmatpush.bf16.msra.mxu1 %v1595_v29  ;;  %v1805_v25 = vor.u32 %v2071_v22, %v1802_v24  ;;  %v1793_v29 = vor.u32 %v2070_v27, %v1792_v26  ;;  %v1864_v27 = vld [vmem:[#allocation5 + $0x3d0] sm:$0xf] }
  0x66   :  { %900 = vmatpush.bf16.msra.mxu0 %v1523_v32  ;;  %v1784_v32 = vld [vmem:[#allocation5 + $0x330] sm:$0xf] }
  0x67   :  { %941 = vmatpush.bf16.msrb.mxu2 %v1723_v30  ;;  %v1794_v30 = vld [vmem:[#allocation5 + $0x348] sm:$0xf0]  ;;  %v1785_v35 = vor.u32 %v2068_v33, %v1784_v32  ;;  %v1866_v32 = vld [vmem:[#allocation5 + $0x3d8] sm:$0xf0] }
  0x68   :  { %928 = vmatpush.bf16.msra.mxu3 %v1651_v36  ;;  %v1797_v31 = vor.u32 %v2069_v28, %v1794_v30  ;;  %v1786_v36 = vld [vmem:[#allocation5 + $0x338] sm:$0xf0]  ;;  %v2088_v28 = vld [vmem:[#allocation5 + $0x3d4] sm:$0xf0] }
  0x69   :  { %914 = vmatpush.bf16.msra.mxu1 %v1587_v42  ;;  %v1789_v38 = vor.u32 %v2067_v34, %v1786_v36  ;;  %v1777_v42 = vor.u32 %v2066_v40, %v1776_v39  ;;  %v1865_v30 = vor.u32 %v2088_v28, %v1864_v27  ;;  %v1856_v40 = vld [vmem:[#allocation5 + $0x3c0] sm:$0xf] }
  0x6a   :  { %901 = vmatpush.bf16.msra.mxu0 %v1515_v46  ;;  %v2291_v46 = vld [vmem:[#allocation7] ss:$8 sm:$0x3] }
  0x6b   :  { %942 = vmatpush.bf16.msrb.mxu2 %v1715_v43  ;;  %v1778_v43 = vld [vmem:[#allocation5 + $0x328] sm:$0xf0]  ;;  %v236_v58 = vperm.slane %v2291_v46, 0 }
  0x6c   :  { %929 = vmatpush.bf16.msra.mxu3 %v1643_v51  ;;  %v1781_v45 = vor.u32 %v2065_v41, %v1778_v43  ;;  %v2064_v51 = vld [vmem:[#allocation5 + $0x314] sm:$0xf0]  ;;  %v2086_v41 = vld [vmem:[#allocation5 + $0x3c4] sm:$0xf0] }
  0x6d   :  { %915 = vmatpush.bf16.msra.mxu1 %v1579_v59  ;;  %v1769_v53 = vor.u32 %v2064_v51, %v1768_v50  ;;  %v1857_v43 = vor.u32 %v2086_v41, %v1856_v40  ;;  %v2110_v40 = vld [vmem:[#allocation5 + $0x504] sm:$0xf0]  ;;  %v1920_v41 = vld [vmem:[#allocation5 + $0x470] sm:$0xf] }
  0x6e   :  { %902 = vmatpush.bf16.msra.mxu0 %v1507_v62 }
  0x6f   :  { %943 = vmatpush.bf16.msrb.mxu2 %v1707_v61 }
  0x70   :  { %930 = vmatpush.bf16.msra.mxu3 %v1635_v2 }
  0x71   :  { %916 = vmatpush.bf16.msra.mxu1 %v1571_v7  ;;  %903 = vmatmul.bf16.vlgmr.msra.gmra.mxu0 %v2261_v54  ;;  %v1817_v54 = vor.u32 %v2076_v16, %v1816_v15  ;;  %v2093_v7 = vld [vmem:[#allocation5 + $0x404] sm:$0xf]  ;;  %v2091_v15 = vld [vmem:[#allocation5 + $0x3f4] sm:$0xf] }
  0x72   :  { %958 = vmatpush.bf16.msrb.mxu0 %v1763_v6  ;;  %v2094_v6 = vld [vmem:[#allocation5 + $0x404] sm:$0xf0]  ;;  %v1893_v11 = vor.u32 %v2093_v7, %v1890_v9  ;;  %v1832_v7 = vld [vmem:[#allocation5 + $0x390] sm:$0xf]  ;;  %v2079_v9 = vld [vmem:[#allocation5 + $0x394] sm:$0xf] }
  0x73   :  { %931 = vmatmul.bf16.vlgmr.msra.gmra.mxu3 %v2277_v37  ;;  %944 = vmatpush.bf16.msrb.mxu2 %v1699_v8  ;;  %v1818_v37 = vld [vmem:[#allocation5 + $0x378] sm:$0xf0]  ;;  %v1889_v8 = vor.u32 %v2094_v6, %v1888_v5 }
  0x74   :  { %917 = vmatmul.bf16.vlgmr.msra.gmra.mxu1 %v2265_v63  ;;  %v1821_v4 = vor.u32 %v2075_v17, %v1818_v37  ;;  %v1808_v63 = vld [vmem:[#allocation5 + $0x360] sm:$0xf]  ;;  %v1882_v37 = vld [vmem:[#allocation5 + $0x3f8] sm:$0xf0] }
  0x75   :  { %1136 = vmatpush.bf16.msrb.mxu1 %v1825_v12  ;;  %1150 = vmatpush.bf16.msrb.mxu3 %v1889_v8  ;;  %v2080_v8 = vld [vmem:[#allocation5 + $0x394] sm:$0xf0] }
  0x76   :  { %945 = vmatmul.bf16.vlgmr.msrb.gmra.mxu2 %v2279_v44  ;;  %1164 = vmatpush.bf16.msra.mxu0 %v1829_v14  ;;  %v2073_v44 = vld [vmem:[#allocation5 + $0x364] sm:$0xf]  ;;  %v2092_v14 = vld [vmem:[#allocation5 + $0x3f4] sm:$0xf0] }
  0x77   :  { %v1813_v19 = vor.u32 %v2073_v44, %v1810_v60  ;;  %1178 = vmatpush.bf16.msra.mxu2 %v1893_v11  ;;  %v1834_v11 = vld [vmem:[#allocation5 + $0x398] sm:$0xf0] }
  0x79   :  { %1137 = vmatpush.bf16.msrb.mxu1 %v1817_v54  ;;  %v1881_v54 = vor.u32 %v2092_v14, %v1880_v13  ;;  %v237_v13 = vperm.slane %v2291_v46, 1 }
  0x7a   :  { %1165 = vmatpush.bf16.msra.mxu0 %v1821_v4 }
  0x7b   :  { %1151 = vmatpush.bf16.msrb.mxu3 %v1881_v54 }
  0x7e   :  { %1166 = vmatpush.bf16.msra.mxu0 %v1813_v19  ;;  %v2090_v19 = vld [vmem:[#allocation5 + $0x3e4] sm:$0xf0] }
  0x81   :  { %1765 = vmatmul.msk.bf16.vlgmr.msrb.gmra.mxu0 %vm765_vm0, %v2273_v48  ;;  %v1809_v48 = vor.u32 %v2074_v18, %v1808_v63  ;;  %v1885_v63 = vor.u32 %v2091_v15, %v1882_v37 }
  0x82   :  { %1167 = vmatpush.bf16.msra.mxu0 %v1805_v25 }
  0x83   :  { %1138 = vmatpush.bf16.msrb.mxu1 %v1809_v48  ;;  %1179 = vmatpush.bf16.msra.mxu2 %v1885_v63  ;;  %v1872_v48 = vld [vmem:[#allocation5 + $0x3e0] sm:$0xf] }
  0x84   :  { %v1873_v22 = vor.u32 %v2090_v19, %v1872_v48 }
  0x86   :  { %1168 = vmatpush.bf16.msra.mxu0 %v1797_v31  ;;  %1152 = vmatpush.bf16.msrb.mxu3 %v1873_v22  ;;  %v2087_v31 = vld [vmem:[#allocation5 + $0x3d4] sm:$0xf] }
  0x87   :  { %1139 = vmatpush.bf16.msrb.mxu1 %v1801_v23  ;;  %v1874_v23 = vld [vmem:[#allocation5 + $0x3e8] sm:$0xf0]  ;;  %v1869_v34 = vor.u32 %v2087_v31, %v1866_v32 }
  0x88   :  { %v1877_v24 = vor.u32 %v2089_v20, %v1874_v23 }
  0x8a   :  { %1169 = vmatpush.bf16.msra.mxu0 %v1789_v38  ;;  %1180 = vmatpush.bf16.msra.mxu2 %v1877_v24 }
  0x8b   :  { %1140 = vmatpush.bf16.msrb.mxu1 %v1793_v29  ;;  %1153 = vmatpush.bf16.msrb.mxu3 %v1865_v30 }
  0x8e   :  { %1170 = vmatpush.bf16.msra.mxu0 %v1781_v45  ;;  %1181 = vmatpush.bf16.msra.mxu2 %v1869_v34  ;;  %v1858_v45 = vld [vmem:[#allocation5 + $0x3c8] sm:$0xf0] }
  0x8f   :  { %1141 = vmatpush.bf16.msrb.mxu1 %v1785_v35  ;;  %1154 = vmatpush.bf16.msrb.mxu3 %v1857_v43 }
  0x92   :  { %1171 = vmatpush.bf16.msra.mxu0 %v1773_v57  ;;  %v1850_v57 = vld [vmem:[#allocation5 + $0x3b8] sm:$0xf0] }
  0x93   :  { %1142 = vmatpush.bf16.msrb.mxu1 %v1777_v42  ;;  %v2085_v42 = vld [vmem:[#allocation5 + $0x3c4] sm:$0xf] }
  0x97   :  { %1143 = vmatpush.bf16.msrb.mxu1 %v1769_v53  ;;  %v2084_v53 = vld [vmem:[#allocation5 + $0x3b4] sm:$0xf0] }
  0x98   :  { %v1849_v55 = vor.u32 %v2084_v53, %v1848_v52  ;;  %v2100_v52 = vld [vmem:[#allocation5 + $0x464] sm:$0xf0]  ;;  %v1948_v53 = vld [vmem:[#allocation5 + $0x4e0] sm:$0xf] }
  0x9a   :  { %1155 = vmatpush.bf16.msrb.mxu3 %v1849_v55  ;;  %v2108_v55 = vld [vmem:[#allocation5 + $0x4e4] sm:$0xf0] }
  0xae   :  { %v778_v47 = vpop.f32.mrf.mxu0 }
  0xaf   :  { %v779_v59 = vadd.f32 %v778_v47, %v236_v58 }
  0xb1   :  { %v792_v56 = vpop.f32.mrf.mxu1 }
  0xb2   :  { %v793_v0 = vadd.f32 %v792_v56, %v779_v59  ;;  %v2083_v56 = vld [vmem:[#allocation5 + $0x3b4] sm:$0xf] }
  0xb3   :  { %v1853_v59 = vor.u32 %v2083_v56, %v1850_v57  ;;  %v1949_v57 = vor.u32 %v2108_v55, %v1948_v53 }
  0xb5   :  { %v806_v49 = vpop.f32.mrf.mxu2 }
  0xb6   :  { %v780_v61 = vpop.f32.mrf.mxu0  ;;  %v820_v1 = vpop.f32.mrf.mxu3  ;;  %v807_v10 = vadd.f32 %v806_v49, %v793_v0  ;;  %v1861_v49 = vor.u32 %v2085_v42, %v1858_v45  ;;  %v2082_v0 = vld [vmem:[#allocation5 + $0x3a4] sm:$0xf0]  ;;  %v2101_v42 = vld [vmem:[#allocation5 + $0x474] sm:$0xf0]  ;;  %v1952_v45 = vld [vmem:[#allocation5 + $0x4f0] sm:$0xf] }
  0xb7   :  { %v781_v3 = vadd.f32 %v780_v61, %v236_v58 }
  0xb8   :  { %v821_v4 = vadd.f32 %v820_v1, %v807_v10  ;;  %1182 = vmatpush.bf16.msra.mxu2 %v1861_v49  ;;  %v2081_v1 = vld [vmem:[#allocation5 + $0x3a4] sm:$0xf]  ;;  %v1833_v10 = vor.u32 %v2080_v8, %v1832_v7  ;;  %v1921_v49 = vor.u32 %v2101_v42, %v1920_v41  ;;  %v2106_v7 = vld [vmem:[#allocation5 + $0x4c4] sm:$0xf0] }
  0xb9   :  { %v794_v2 = vpop.f32.mrf.mxu1 }
  0xba   :  { %v795_v12 = vadd.f32 %v794_v2, %v781_v3  ;;  %v1842_v3 = vld [vmem:[#allocation5 + $0x3a8] sm:$0xf0] }
  0xbb   :  { %v1845_v6 = vor.u32 %v2081_v1, %v1842_v3  ;;  %v2098_v3 = vld [vmem:[#allocation5 + $0x444] sm:$0xf0] }
  0xbc   :  { %1183 = vmatpush.bf16.msra.mxu2 %v1853_v59  ;;  %v2099_v59 = vld [vmem:[#allocation5 + $0x454] sm:$0xf0] }
  0xbd   :  { %v808_v62 = vpop.f32.mrf.mxu2 }
  0xbe   :  { %v809_v44 = vadd.f32 %v808_v62, %v795_v12  ;;  %v822_v21 = vpop.f32.mrf.mxu3  ;;  %v1840_v62 = vld [vmem:[#allocation5 + $0x3a0] sm:$0xf]  ;;  %v1837_v12 = vor.u32 %v2079_v9, %v1834_v11  ;;  %v1904_v9 = vld [vmem:[#allocation5 + $0x430] sm:$0xf] }
  0xbf   :  { %v1841_v2 = vor.u32 %v2082_v0, %v1840_v62  ;;  %v2107_v62 = vld [vmem:[#allocation5 + $0x4d4] sm:$0xf0]  ;;  %v1936_v11 = vld [vmem:[#allocation5 + $0x4b0] sm:$0xf] }
  0xc0   :  { %v823_v25 = vadd.f32 %v822_v21, %v809_v44  ;;  %1184 = vmatpush.bf16.msra.mxu2 %v1845_v6 }
  0xc1   :  { %1156 = vmatpush.bf16.msrb.mxu3 %v1841_v2  ;;  %v1908_v2 = vld [vmem:[#allocation5 + $0x440] sm:$0xf] }
  0xc2   :  { %v1909_v6 = vor.u32 %v2098_v3, %v1908_v2 }
  0xc4   :  { %1185 = vmatpush.bf16.msra.mxu2 %v1837_v12 }
  0xc5   :  { %v862_v17 = vpop.f32.mrf.mxu2  ;;  %1157 = vmatpush.bf16.msrb.mxu3 %v1833_v10  ;;  %v2097_v10 = vld [vmem:[#allocation5 + $0x434] sm:$0xf0] }
  0xc6   :  { %v1905_v12 = vor.u32 %v2097_v10, %v1904_v9 }
  0xcd   :  { %v864_v36 = vpop.f32.mrf.mxu2 }
  0xce   :  { %v834_v16 = vpop.f32.mrf.mxu0 }
  0xcf   :  { %v835_v60 = vadd.f32 %v834_v16, %v821_v4 }
  0xd1   :  { %v848_v18 = vpop.f32.mrf.mxu1 }
  0xd2   :  { %v849_v26 = vadd.f32 %v848_v18, %v835_v60 }
  0xd4   :  { %v863_v38 = vadd.f32 %v862_v17, %v849_v26 }
  0xd6   :  { %v836_v29 = vpop.f32.mrf.mxu0  ;;  %v965_v50 = vmax.f32 %v863_v38, 0.0  ;;  %v876_v61 = vpop.f32.mrf.mxu3  ;;  %v1956_v38 = vld [vmem:[#allocation5 + $0x500] sm:$0xf] }
  0xd7   :  { %v837_v33 = vadd.f32 %v836_v29, %v823_v25  ;;  %v877_v17 = vadd.f32 %v876_v61, %v237_v13  ;;  %v1957_v43 = vor.u32 %v2110_v40, %v1956_v38  ;;  %v1944_v61 = vld [vmem:[#allocation5 + $0x4d0] sm:$0xf] }
  0xd8   :  { %v1945_v1 = vor.u32 %v2107_v62, %v1944_v61 }
  0xd9   :  { %v850_v35 = vpop.f32.mrf.mxu1  ;;  %v890_v5 = vpop.f32.mrf.mxu2  ;;  %1308 = vmatpush.bf16.msra.mxu3 %v1957_v43 }
  0xda   :  { %v851_v39 = vadd.f32 %v850_v35, %v837_v33  ;;  %v891_v37 = vadd.f32 %v890_v5, %v877_v17  ;;  %v1924_v35 = vld [vmem:[#allocation5 + $0x480] sm:$0xf] }
  0xdb   :  { %v1940_v5 = vld [vmem:[#allocation5 + $0x4c0] sm:$0xf] }
  0xdc   :  { %v865_v47 = vadd.f32 %v864_v36, %v851_v39  ;;  %v2102_v36 = vld [vmem:[#allocation5 + $0x484] sm:$0xf0]  ;;  %v1941_v8 = vor.u32 %v2106_v7, %v1940_v5  ;;  %v1932_v17 = vld [vmem:[#allocation5 + $0x4a0] sm:$0xf] }
  0xdd   :  { %v1925_v39 = vor.u32 %v2102_v36, %v1924_v35 }
  0xde   :  { %v967_v51 = vmax.f32 %v865_v47, 0.0  ;;  %v878_v14 = vpop.f32.mrf.mxu3  ;;  %v2109_v47 = vld [vmem:[#allocation5 + $0x4f4] sm:$0xf0] }
  0xdf   :  { %v879_v4 = vadd.f32 %v878_v14, %v237_v13  ;;  %1294 = vmatpush.bf16.msra.mxu1 %v1925_v39  ;;  %v2105_v13 = vld [vmem:[#allocation5 + $0x4b4] sm:$0xf0] }
  0xe0   :  { %v969_v58 = vpack.c.bf16 %v967_v51, %v965_v50  ;;  %v1953_v50 = vor.u32 %v2109_v47, %v1952_v45  ;;  %v1916_v51 = vld [vmem:[#allocation5 + $0x460] sm:$0xf]  ;;  %v1937_v14 = vor.u32 %v2105_v13, %v1936_v11 }
  0xe1   :  { %v892_v16 = vpop.f32.mrf.mxu2  ;;  %v1917_v56 = vor.u32 %v2100_v52, %v1916_v51 }
  0xe2   :  { %1144 = vmatmul.bf16.vlgmr.msrb.gmra.mxu1 %v969_v58  ;;  %1172 = vmatmul.bf16.vlgmr.msra.gmra.mxu0 %v969_v58  ;;  %v893_v60 = vadd.f32 %v892_v16, %v879_v4  ;;  %v1912_v58 = vld [vmem:[#allocation5 + $0x450] sm:$0xf]  ;;  %v2096_v16 = vld [vmem:[#allocation5 + $0x424] sm:$0xf0] }
  0xe3   :  { %1295 = vmatpush.bf16.msra.mxu1 %v1921_v49  ;;  %1309 = vmatpush.bf16.msra.mxu3 %v1953_v50  ;;  %v1913_v0 = vor.u32 %v2099_v59, %v1912_v58  ;;  %v234_v49 = vld [vmem:[#allocation7 + $0x2] ss:$0 sm:$0xff] }
  0xe7   :  { %1296 = vmatpush.bf16.msra.mxu1 %v1917_v56  ;;  %1310 = vmatpush.bf16.msra.mxu3 %v1949_v57 }
  0xeb   :  { %1297 = vmatpush.bf16.msra.mxu1 %v1913_v0  ;;  %1311 = vmatpush.bf16.msra.mxu3 %v1945_v1 }
  0xee   :  { %v904_v15 = vpop.f32.mrf.mxu0 }
  0xef   :  { %v905_v48 = vadd.f32 %v904_v15, %v891_v37  ;;  %1298 = vmatpush.bf16.msra.mxu1 %v1909_v6  ;;  %1312 = vmatpush.bf16.msra.mxu3 %v1941_v8  ;;  %v1900_v15 = vld [vmem:[#allocation5 + $0x420] sm:$0xf]  ;;  %v2104_v37 = vld [vmem:[#allocation5 + $0x4a4] sm:$0xf0] }
  0xf0   :  { %v1933_v4 = vor.u32 %v2104_v37, %v1932_v17 }
  0xf1   :  { %v918_v54 = vpop.f32.mrf.mxu1 }
  0xf2   :  { %v919_v21 = vadd.f32 %v918_v54, %v905_v48  ;;  %v1901_v54 = vor.u32 %v2096_v16, %v1900_v15  ;;  %v2103_v48 = vld [vmem:[#allocation5 + $0x494] sm:$0xf0] }
  0xf3   :  { %1299 = vmatpush.bf16.msra.mxu1 %v1905_v12  ;;  %1313 = vmatpush.bf16.msra.mxu3 %v1937_v14 }
  0xf6   :  { %v932_v63 = vpop.f32.mrf.mxu3  ;;  %v906_v18 = vpop.f32.mrf.mxu0 }
  0xf7   :  { %v907_v19 = vadd.f32 %v906_v18, %v893_v60  ;;  %v933_v24 = vadd.f32 %v932_v63, %v919_v21  ;;  %1300 = vmatpush.bf16.msra.mxu1 %v1901_v54  ;;  %1314 = vmatpush.bf16.msra.mxu3 %v1933_v4  ;;  %v1896_v63 = vld [vmem:[#allocation5 + $0x410] sm:$0xf]  ;;  %v2095_v18 = vld [vmem:[#allocation5 + $0x414] sm:$0xf0] }
  0xf8   :  { %v1897_v60 = vor.u32 %v2095_v18, %v1896_v63 }
  0xf9   :  { %v946_v44 = vpop.f32.mrf.mxu2  ;;  %v920_v20 = vpop.f32.mrf.mxu1 }
  0xfa   :  { %v921_v46 = vadd.f32 %v920_v20, %v907_v19  ;;  %v947_v27 = vadd.f32 %v946_v44, %v933_v24  ;;  %v1928_v44 = vld [vmem:[#allocation5 + $0x490] sm:$0xf] }
  0xfb   :  { %v1929_v19 = vor.u32 %v2103_v48, %v1928_v44  ;;  %1301 = vmatpush.bf16.msra.mxu1 %v1897_v60 }
  0xfd   :  { %1315 = vmatpush.bf16.msra.mxu3 %v1929_v19 }
  0xfe   :  { %v934_v22 = vpop.f32.mrf.mxu3  ;;  %v960_v23 = vpop.f32.mrf.mxu0 }
  0xff   :  { %v935_v25 = vadd.f32 %v934_v22, %v921_v46  ;;  %v961_v28 = vadd.f32 %v960_v23, %v947_v27  ;;  %v233_v22 = vld [vmem:[#allocation7 + $0x1] ss:$8 sm:$0x3] }
 0x100   :  { %v972_v46 = vperm.slane %v233_v22, 0 }
 0x101   :  { %v948_v26 = vpop.f32.mrf.mxu2  ;;  %v966_v32 = vmax.f32 %v961_v28, 0.0 }
 0x102   :  { %v949_v29 = vadd.f32 %v948_v26, %v935_v25  ;;  %v973_v25 = vperm.slane %v233_v22, 1 }
 0x106   :  { %v962_v30 = vpop.f32.mrf.mxu0 }
 0x107   :  { %v963_v31 = vadd.f32 %v962_v30, %v949_v29 }
 0x109   :  { %v968_v33 = vmax.f32 %v963_v31, 0.0 }
 0x10b   :  { %v970_v34 = vpack.c.bf16 %v968_v33, %v966_v32 }
 0x10d   :  { %1158 = vmatmul.bf16.vlgmr.msrb.gmra.mxu3 %v970_v34  ;;  %1186 = vmatmul.bf16.vlgmr.msra.gmra.mxu2 %v970_v34 }
 0x15f   :  { %v1145_v20 = vpop.f32.mrf.mxu1  ;;  %v1173_v21 = vpop.f32.mrf.mxu0 }
 0x160   :  { %v1146_v28 = vadd.f32 %v1145_v20, %v972_v46  ;;  %v1174_v29 = vadd.f32 %v1173_v21, %v973_v25 }
 0x167   :  { %v1147_v26 = vpop.f32.mrf.mxu1  ;;  %v1175_v27 = vpop.f32.mrf.mxu0 }
 0x168   :  { %v1148_v30 = vadd.f32 %v1147_v26, %v972_v46  ;;  %v1176_v31 = vadd.f32 %v1175_v27, %v973_v25 }
 0x190   :  { %v1159_v23 = vpop.f32.mrf.mxu3  ;;  %v1187_v24 = vpop.f32.mrf.mxu2 }
 0x191   :  { %v1160_v32 = vadd.f32 %v1159_v23, %v1146_v28  ;;  %v1188_v33 = vadd.f32 %v1187_v24, %v1174_v29 }
 0x193   :  { %v1192_v39 = vmax.f32 %v1160_v32, 0.0  ;;  %v1193_v40 = vmax.f32 %v1188_v33, 0.0 }
 0x198   :  { %v1161_v34 = vpop.f32.mrf.mxu3  ;;  %v1189_v35 = vpop.f32.mrf.mxu2 }
 0x199   :  { %v1162_v36 = vadd.f32 %v1161_v34, %v1148_v30  ;;  %v1190_v38 = vadd.f32 %v1189_v35, %v1176_v31 }
 0x19b   :  { %v1194_v41 = vmax.f32 %v1162_v36, 0.0  ;;  %v1195_v42 = vmax.f32 %v1190_v38, 0.0 }
 0x19d   :  { %v1196_v43 = vpack.c.bf16 %v1194_v41, %v1192_v39  ;;  %v1197_v45 = vpack.c.bf16 %v1195_v42, %v1193_v40 }
 0x19f   :  { %1302 = vmatmul.bf16.vlgmr.msra.gmra.mxu1 %v1196_v43  ;;  %1316 = vmatmul.bf16.vlgmr.msra.gmra.mxu3 %v1197_v45 }
 0x21c   :  { %v1303_v47 = vpop.f32.mrf.mxu1 }
 0x21d   :  { %v1304_v50 = vadd.f32 %v1303_v47, %v234_v49 }
 0x222   :  { %v1317_v51 = vpop.f32.mrf.mxu3 }
 0x223   :  { %v1318_v52 = vadd.f32 %v1317_v51, %v1304_v50 }
 0x224   :  { %v1305_v53 = vpop.f32.mrf.mxu1 }
 0x225   :  { %1322 = vst [vmem:[#allocation8] sm:$0xff] %v1318_v52  ;;  %v1306_v55 = vadd.f32 %v1305_v53, %v234_v49 }
 0x22a   :  { %v1319_v56 = vpop.f32.mrf.mxu3 }
 0x22b   :  { %v1320_v57 = vadd.f32 %v1319_v56, %v1306_v55 }
 0x22d   :  { %1323 = vst [vmem:[#allocation8 + $0x8] sm:$0xff] %v1320_v57 }
 0x22e   :  { %1336 = dma.vmem_to_hbm [thread:$0]  %s1329_s29, 256, %s1331_s5, [#allocation4], %s2222_s20, %s2222_s20, %s2223_s21  }
 0x22f   :  { %2219 = dma.done.wait [#allocation4], 256  }
 0x230   :  { %2220 = vsyncadd [#allocation4], 4294967040 }
 0x231   :  { %1341 = vsyncpa [#allocation3], 1 }
 0x232   :  { %1342 = vsyncpa [#allocation6], 1 }
 0x233   :  { %1343 = vsyncpa [#allocation4], 1 }

</bundles_post_ra>
